<compile_context>
chip_gen: v7x
topology: tpu7x:2x2x1
jax: 0.10.0
libtpu: 0.0.40
codegen_flags: <defaults>
</compile_context>

<pallas_src>
import functools

import jax
import jax.numpy as jnp
from jax.experimental import pallas as pl
from jax.experimental.pallas import tpu as pltpu

LANES = 128                      # lane width (last dim of every block)
TM_MAX = 4096                    # max sublane rows per grid step (f32: 2 MiB/input)
VMEM_LIMIT = 32 * 1024 * 1024    # safe on v5e (16 MiB default), v6e/v7x defaults


def _round_up(x, m):
    return ((x + m - 1) // m) * m


def _round_down(x, m):
    return (x // m) * m


def _sublane_multiple(*dtypes):
    """Required sublane multiple for the block height given the input dtypes."""
    m = 8
    for dt in dtypes:
        bits = jnp.dtype(dt).itemsize * 8
        m = max(m, max(8, 256 // bits))   # f32 -> 8, bf16 -> 16, int8/bool -> 32
    return m


def _num_tensorcores():
    """Best-effort TensorCore count: 2 on megacore parts (v4 / v7x), else 1."""
    try:
        kind = jax.devices()[0].device_kind.lower()
    except Exception:
        return 1
    if "v7" in kind or "7x" in kind or "v4" in kind:
        return 2
    return 1


def _mask_mse_kernel(x_ref, t_ref, m_ref, out_ref, *,
                     tm, steps, rows_all, needs_mask):
    """Accumulate per-lane partials into a resident (32, LANES) slab.

    Rows  0: 8 -> sum((x-t)^2 [mask==1])      Rows 16:24 -> count(mask==1)
    Rows  8:16 -> sum((x-t)^2 [mask==0])      Rows 24:32 -> count(mask==0)
    """
    pi = pl.program_id(0)
    i = pl.program_id(1)

    @pl.when(i == 0)
    def _():
        out_ref[...] = jnp.zeros_like(out_ref)

    x = x_ref[...].astype(jnp.float32)
    t = t_ref[...].astype(jnp.float32)
    m = m_ref[...].astype(jnp.float32)

    if needs_mask:
        # Logical (unclamped) global row ids of this block; overrun blocks
        # (whose DMA block index was clamped in the index_map) mask out fully.
        row_start = (pi * steps + i) * tm
        rows = jax.lax.broadcasted_iota(jnp.int32, (tm, 1), 0) + row_start
        valid = rows < rows_all
        # Invalid rows get a mask value matching neither ==1 nor ==0, so they
        # drop out of all four partials; the selects below also stop any
        # NaN/garbage from the padded x/t rows from propagating.
        m = jnp.where(valid, m, -1.0)

    d = x - t
    sq = d * d
    fg = m == 1.0
    bg = m == 0.0

    g = tm // 8

    def fold(v):
        # (tm, LANES) -> (8, LANES): pure cross-vreg VPU adds, no XLU reduce.
        return jnp.sum(v.reshape(g, 8, LANES), axis=0)

    fg_sq = fold(jnp.where(fg, sq, 0.0))
    bg_sq = fold(jnp.where(bg, sq, 0.0))
    fg_cnt = fold(jnp.where(fg, 1.0, 0.0))
    bg_cnt = fold(jnp.where(bg, 1.0, 0.0))

    # One combined accumulator update per grid step ((32,128)-aligned store).
    out_ref[...] += jnp.concatenate([fg_sq, bg_sq, fg_cnt, bg_cnt], axis=0)


def _tail_sums(x, t, m):
    """Plain-JAX reduction for the <128-element lane remainder."""
    x = x.astype(jnp.float32)
    t = t.astype(jnp.float32)
    m = m.astype(jnp.float32)
    sq = (x - t) ** 2
    fg = m == 1.0
    bg = m == 0.0
    return (jnp.sum(jnp.where(fg, sq, 0.0)),
            jnp.sum(jnp.where(bg, sq, 0.0)),
            jnp.sum(fg.astype(jnp.float32)),
            jnp.sum(bg.astype(jnp.float32)))


def mask_mse_loss(inp, tgt, mask, alpha=1.0, *, num_cores=None, tm_max=TM_MAX):
    """Pallas implementation of MaskMSELoss.forward.

    Returns (mse_loss_mean, bg_mask_loss_mean):
      mse_loss_mean     = alpha * sum((x-t)^2 [mask==1]) / (count(mask==1) + 1e-6)
      bg_mask_loss_mean = 0.2   * sum((x-t)^2 [mask==0]) / (count(mask==0) + 1e-6)
    """
    assert inp.shape == tgt.shape == mask.shape
    n = inp.size
    sub = _sublane_multiple(inp.dtype, tgt.dtype, mask.dtype)
    p = int(num_cores) if num_cores else _num_tensorcores()

    # Free reshapes only — no pad, no astype on the full tensors.
    xf = inp.reshape(-1)
    tf = tgt.reshape(-1)
    mf = mask.reshape(-1)

    rows_all = n // LANES
    n_lane = rows_all * LANES

    fg_sq = bg_sq = fg_cnt = bg_cnt = jnp.float32(0.0)
    covered = 0

    if rows_all >= sub:
        # Block height: large enough to amortize per-step overhead, a multiple
        # of the sublane requirement, and never taller than the array.
        tm = max(sub, min(_round_up(pl.cdiv(rows_all, p), sub),
                          _round_down(rows_all, sub),
                          _round_down(tm_max, sub)))
        nblocks = pl.cdiv(rows_all, tm)
        steps = pl.cdiv(nblocks, p)
        needs_mask = (p * steps * tm) != rows_all

        if n_lane == n:
            # Pure (free) reshape — no copy materialized for the pallas_call.
            x2 = xf.reshape(rows_all, LANES)
            t2 = tf.reshape(rows_all, LANES)
            m2 = mf.reshape(rows_all, LANES)
        else:
            # TODO(synk): when n % 128 != 0 this prefix slice may materialize a
            # copy; only the sub-128-element remainder goes through the tail.
            x2 = xf[:n_lane].reshape(rows_all, LANES)
            t2 = tf[:n_lane].reshape(rows_all, LANES)
            m2 = mf[:n_lane].reshape(rows_all, LANES)

        def in_map(pi, i):
            # Clamp so overrun blocks (only when p*steps*tm > rows_all) re-read
            # the last valid block; the kernel masks their rows out anyway.
            return (jnp.minimum(pi * steps + i, nblocks - 1), 0)

        kernel = functools.partial(_mask_mse_kernel, tm=tm, steps=steps,
                                   rows_all=rows_all, needs_mask=needs_mask)

        in_bytes = n_lane * (jnp.dtype(inp.dtype).itemsize
                             + jnp.dtype(tgt.dtype).itemsize
                             + jnp.dtype(mask.dtype).itemsize)
        cost = pl.CostEstimate(flops=10 * n_lane, transcendentals=0,
                               bytes_accessed=in_bytes + p * 32 * LANES * 4)

        parts = pl.pallas_call(
            kernel,
            out_shape=jax.ShapeDtypeStruct((p, 32, LANES), jnp.float32),
            grid_spec=pltpu.PrefetchScalarGridSpec(
                num_scalar_prefetch=0,
                grid=(p, steps),                         # reduction axis last
                in_specs=[
                    pl.BlockSpec((tm, LANES), in_map),
                    pl.BlockSpec((tm, LANES), in_map),
                    pl.BlockSpec((tm, LANES), in_map),
                ],
                # Squeezed leading dim -> each core owns a resident (32, LANES)
                # accumulator block, constant across the reduction axis.
                out_specs=pl.BlockSpec((None, 32, LANES),
                                       lambda pi, i: (pi, 0, 0)),
            ),
            compiler_params=pltpu.CompilerParams(
                dimension_semantics=("parallel", "arbitrary"),
                vmem_limit_bytes=VMEM_LIMIT),
            cost_estimate=cost,
        )(x2, t2, m2)

        sums = jnp.sum(parts.reshape(p, 4, 8, LANES), axis=(0, 2, 3))
        fg_sq, bg_sq, fg_cnt, bg_cnt = sums[0], sums[1], sums[2], sums[3]
        covered = n_lane

    if covered < n:   # lane remainder (and tiny-input case) in plain JAX
        tfg_sq, tbg_sq, tfg_cnt, tbg_cnt = _tail_sums(
            xf[covered:], tf[covered:], mf[covered:])
        fg_sq = fg_sq + tfg_sq
        bg_sq = bg_sq + tbg_sq
        fg_cnt = fg_cnt + tfg_cnt
        bg_cnt = bg_cnt + tbg_cnt

    mse_loss_mean = alpha * fg_sq / (fg_cnt + 1e-6)
    bg_mask_loss_mean = bg_sq * 0.2 / (bg_cnt + 1e-6)
    return mse_loss_mean, bg_mask_loss_mean


def _reference(inp, tgt, mask, alpha=1.0):
    x = inp.astype(jnp.float32)
    t = tgt.astype(jnp.float32)
    m = mask.astype(jnp.float32)
    sq = (x - t) ** 2
    fg = m == 1.0
    bg = m == 0.0
    fg_loss = jnp.sum(jnp.where(fg, sq, 0.0))
    bg_loss = jnp.sum(jnp.where(bg, sq, 0.0))
    fg_cnt = jnp.sum(fg.astype(jnp.float32))
    bg_cnt = jnp.sum(bg.astype(jnp.float32))
    return (alpha * fg_loss / (fg_cnt + 1e-6),
            bg_loss * 0.2 / (bg_cnt + 1e-6))


if __name__ == "__main__":
    key = jax.random.PRNGKey(0)
    alpha = 1.0

    cases = [
        ((2, 4, 16, 16), TM_MAX),   # lane-aligned, single grid step
        ((2, 3, 17, 19), TM_MAX),   # ragged rows: in-kernel masking + JAX tail
        ((2, 4, 32, 32), 16),       # tiny tm_max -> multi-step accumulation
    ]
    for shape, tm_max in cases:
        key, k1, k2, k3 = jax.random.split(key, 4)
        inp = jax.random.normal(k1, shape, dtype=jnp.float32)
        tgt = jax.random.normal(k2, shape, dtype=jnp.float32)
        # binary mask (0/1), like a segmentation mask
        mask = (jax.random.uniform(k3, shape) > 0.5).astype(jnp.float32)

        out_fg, out_bg = mask_mse_loss(inp, tgt, mask, alpha=alpha, tm_max=tm_max)
        jax.block_until_ready((out_fg, out_bg))

        ref_fg, ref_bg = _reference(inp, tgt, mask, alpha=alpha)
        assert jnp.allclose(out_fg, ref_fg, rtol=1e-5, atol=1e-5), (shape, out_fg, ref_fg)
        assert jnp.allclose(out_bg, ref_bg, rtol=1e-5, atol=1e-5), (shape, out_bg, ref_bg)

    print("KERNEL_OK")
</pallas_src>

<mosaic_0001>
module attributes {stable_mosaic.version = 11 : i64} {
  func.func @_mask_mse_kernel(%arg0: i32, %arg1: i32, %arg2: memref<16x128xf32, #tpu.memory_space<vmem>>, %arg3: memref<16x128xf32, #tpu.memory_space<vmem>>, %arg4: memref<16x128xf32, #tpu.memory_space<vmem>>, %arg5: memref<1x32x128xf32, #tpu.memory_space<vmem>>) attributes {dimension_semantics = [#tpu.dimension_semantics<parallel>, #tpu.dimension_semantics<arbitrary>], iteration_bounds = array<i64: 1, 1>, scalar_prefetch = 0 : i64, scratch_operands = 0 : i64, tpu.core_type = #tpu.core_type<tc>, window_params = [{transform_indices = @transform_0, window_bounds = array<i64: 16, 128>}, {transform_indices = @transform_1, window_bounds = array<i64: 16, 128>}, {transform_indices = @transform_2, window_bounds = array<i64: 16, 128>}, {transform_indices = @transform_3, window_bounds = array<i64: 1, 32, 128>}]} {
    %c0_i32 = arith.constant 0 : i32
    %0 = arith.cmpi eq, %arg1, %c0_i32 : i32
    %1 = arith.extui %0 : i1 to i32
    %c0_i32_0 = arith.constant 0 : i32
    %2 = arith.cmpi ne, %1, %c0_i32_0 : i32
    scf.if %2 {
      %cst_23 = arith.constant 0.000000e+00 : f32
      %37 = vector.broadcast %cst_23 : f32 to vector<32x128xf32>
      %c0_24 = arith.constant 0 : index
      %c0_25 = arith.constant 0 : index
      %c0_26 = arith.constant 0 : index
      %38 = vector.load %arg5[%c0_24, %c0_25, %c0_26] : memref<1x32x128xf32, #tpu.memory_space<vmem>>, vector<1x32x128xf32>
      %39 = vector.shape_cast %38 : vector<1x32x128xf32> to vector<32x128xf32>
      %40 = vector.shape_cast %37 : vector<32x128xf32> to vector<1x32x128xf32>
      tpu.vector_store %arg5[%c0_24, %c0_25, %c0_26], %40 {strides = array<i32>} : memref<1x32x128xf32, #tpu.memory_space<vmem>>, vector<1x32x128xf32>,
    } else {
    }
    %c0 = arith.constant 0 : index
    %c0_1 = arith.constant 0 : index
    %3 = vector.load %arg2[%c0, %c0_1] : memref<16x128xf32, #tpu.memory_space<vmem>>, vector<16x128xf32>
    %c0_2 = arith.constant 0 : index
    %c0_3 = arith.constant 0 : index
    %4 = vector.load %arg3[%c0_2, %c0_3] : memref<16x128xf32, #tpu.memory_space<vmem>>, vector<16x128xf32>
    %c0_4 = arith.constant 0 : index
    %c0_5 = arith.constant 0 : index
    %5 = vector.load %arg4[%c0_4, %c0_5] : memref<16x128xf32, #tpu.memory_space<vmem>>, vector<16x128xf32>
    %6 = arith.subf %3, %4 : vector<16x128xf32>
    %7 = arith.mulf %6, %6 : vector<16x128xf32>
    %cst = arith.constant 1.000000e+00 : f32
    %8 = vector.broadcast %cst : f32 to vector<16x128xf32>
    %9 = arith.cmpf oeq, %5, %8 : vector<16x128xf32>
    %cst_6 = arith.constant 0.000000e+00 : f32
    %10 = vector.broadcast %cst_6 : f32 to vector<16x128xf32>
    %11 = arith.cmpf oeq, %5, %10 : vector<16x128xf32>
    %cst_7 = arith.constant 0.000000e+00 : f32
    %12 = vector.broadcast %cst_7 : f32 to vector<16x128xf32>
    %13 = arith.select %9, %7, %12 : vector<16x128xi1>, vector<16x128xf32>
    %14 = vector.shape_cast %13 : vector<16x128xf32> to vector<2x8x128xf32>
    %cst_8 = arith.constant dense<0.000000e+00> : vector<8x128xf32>
    %15 = vector.multi_reduction <add>, %14, %cst_8 [0] : vector<2x8x128xf32> to vector<8x128xf32>
    %cst_9 = arith.constant 0.000000e+00 : f32
    %16 = vector.broadcast %cst_9 : f32 to vector<16x128xf32>
    %17 = arith.select %11, %7, %16 : vector<16x128xi1>, vector<16x128xf32>
    %18 = vector.shape_cast %17 : vector<16x128xf32> to vector<2x8x128xf32>
    %cst_10 = arith.constant dense<0.000000e+00> : vector<8x128xf32>
    %19 = vector.multi_reduction <add>, %18, %cst_10 [0] : vector<2x8x128xf32> to vector<8x128xf32>
    %cst_11 = arith.constant 1.000000e+00 : f32
    %cst_12 = arith.constant 0.000000e+00 : f32
    %20 = vector.broadcast %cst_11 : f32 to vector<16x128xf32>
    %21 = vector.broadcast %cst_12 : f32 to vector<16x128xf32>
    %22 = arith.select %9, %20, %21 : vector<16x128xi1>, vector<16x128xf32>
    %23 = vector.shape_cast %22 : vector<16x128xf32> to vector<2x8x128xf32>
    %cst_13 = arith.constant dense<0.000000e+00> : vector<8x128xf32>
    %24 = vector.multi_reduction <add>, %23, %cst_13 [0] : vector<2x8x128xf32> to vector<8x128xf32>
    %cst_14 = arith.constant 1.000000e+00 : f32
    %cst_15 = arith.constant 0.000000e+00 : f32
    %25 = vector.broadcast %cst_14 : f32 to vector<16x128xf32>
    %26 = vector.broadcast %cst_15 : f32 to vector<16x128xf32>
    %27 = arith.select %11, %25, %26 : vector<16x128xi1>, vector<16x128xf32>
    %28 = vector.shape_cast %27 : vector<16x128xf32> to vector<2x8x128xf32>
    %cst_16 = arith.constant dense<0.000000e+00> : vector<8x128xf32>
    %29 = vector.multi_reduction <add>, %28, %cst_16 [0] : vector<2x8x128xf32> to vector<8x128xf32>
    %c0_17 = arith.constant 0 : index
    %c0_18 = arith.constant 0 : index
    %c0_19 = arith.constant 0 : index
    %30 = vector.load %arg5[%c0_17, %c0_18, %c0_19] : memref<1x32x128xf32, #tpu.memory_space<vmem>>, vector<1x32x128xf32>
    %31 = vector.shape_cast %30 : vector<1x32x128xf32> to vector<32x128xf32>
    %32 = tpu.concatenate %15, %19, %24, %29 in 0 : vector<8x128xf32>, vector<8x128xf32>, vector<8x128xf32>, vector<8x128xf32> -> vector<32x128xf32>
    %33 = arith.addf %31, %32 : vector<32x128xf32>
    %c0_20 = arith.constant 0 : index
    %c0_21 = arith.constant 0 : index
    %c0_22 = arith.constant 0 : index
    %34 = vector.load %arg5[%c0_20, %c0_21, %c0_22] : memref<1x32x128xf32, #tpu.memory_space<vmem>>, vector<1x32x128xf32>
    %35 = vector.shape_cast %34 : vector<1x32x128xf32> to vector<32x128xf32>
    %36 = vector.shape_cast %33 : vector<32x128xf32> to vector<1x32x128xf32>
    tpu.vector_store %arg5[%c0_20, %c0_21, %c0_22], %36 {strides = array<i32>} : memref<1x32x128xf32, #tpu.memory_space<vmem>>, vector<1x32x128xf32>,
    return
  }
  func.func @transform_0(%arg0: i32, %arg1: i32) -> (i32, i32) {
    %c1_i32 = arith.constant 1 : i32
    %0 = arith.muli %arg0, %c1_i32 : i32
    %1 = arith.addi %0, %arg1 : i32
    %c0_i32 = arith.constant 0 : i32
    %2 = arith.minsi %1, %c0_i32 : i32
    %c0_i32_0 = arith.constant 0 : i32
    %c0_i32_1 = arith.constant 0 : i32
    return %2, %c0_i32_0 : i32, i32
  }
  func.func @transform_1(%arg0: i32, %arg1: i32) -> (i32, i32) {
    %c1_i32 = arith.constant 1 : i32
    %0 = arith.muli %arg0, %c1_i32 : i32
    %1 = arith.addi %0, %arg1 : i32
    %c0_i32 = arith.constant 0 : i32
    %2 = arith.minsi %1, %c0_i32 : i32
    %c0_i32_0 = arith.constant 0 : i32
    %c0_i32_1 = arith.constant 0 : i32
    return %2, %c0_i32_0 : i32, i32
  }
  func.func @transform_2(%arg0: i32, %arg1: i32) -> (i32, i32) {
    %c1_i32 = arith.constant 1 : i32
    %0 = arith.muli %arg0, %c1_i32 : i32
    %1 = arith.addi %0, %arg1 : i32
    %c0_i32 = arith.constant 0 : i32
    %2 = arith.minsi %1, %c0_i32 : i32
    %c0_i32_0 = arith.constant 0 : i32
    %c0_i32_1 = arith.constant 0 : i32
    return %2, %c0_i32_0 : i32, i32
  }
  func.func @transform_3(%arg0: i32, %arg1: i32) -> (i32, i32, i32) {
    %c0_i32 = arith.constant 0 : i32
    %c0_i32_0 = arith.constant 0 : i32
    %c0_i32_1 = arith.constant 0 : i32
    return %arg0, %c0_i32, %c0_i32_0 : i32, i32, i32
  }
}

</mosaic_0001>

<bundles_post_ra>
// kernel: tpu_custom_call.1
= control target key start
LH: loop header
LB: loop body
LE: loop exit
PB: predicated region body
PF: predicated region fallthrough
CT: control target
= control target key end

     0   :  { %8 = vsyncpa [#allocation3], 0  ;;  %s351_s0 = inlined_call_operand.hbm [shape: f32[16,128], index: 0, kind: input, shape index: {}]   ;;  %s352_s1 = inlined_call_operand.hbm [shape: f32[16,128], index: 1, kind: input, shape index: {}]   ;;  %s353_s2 = inlined_call_operand.hbm [shape: f32[16,128], index: 2, kind: input, shape index: {}]   ;;  %s354_s3 = inlined_call_operand.hbm [shape: f32[1,32,128], index: 3, kind: output, shape index: {}]  }
   0x1   :  { %9 = vsyncpa [#allocation6], 0 }
   0x2   :  { %10 = vsyncpa [#allocation4], 0  ;;  %s257_s12 = smov [#allocation5]   ;;  %s258_s14 = smov [#allocation2]  }
   0x3   :  { %s40_s13 = sshll.u32 %s257_s12, 4  ;;  %s22_s15 = sshll.u32 %s258_s14, 4  ;;  %s41_s13 = int_to_ptr.vmem [resolvable:$true] %s40_s13  ;;  %s284_s15 = int_to_ptr.vmem [resolvable:$true] %s22_s15 }
   0x4   :  { %s163_s18 = scalar_lea.hbm %s352_s1, 256 }
   0x5   :  { %p164_p0 = scmp.ne.s32.totalorder %s352_s1, %s163_s18  ;;  %p167_p1 = scmp.lt.u32.totalorder %s163_s18, %s352_s1 }
   0x7   :  { %p169_p2 = pnand %p167_p1, %p164_p0 }
   0x9   :  { %172 = shalt.err (!%p169_p2)
}
   0xa   :  { %s173_s23 = scalar_lea.vmem %s41_s13, 256  ;;  %p178_p4 = scmp.lt.s32.totalorder %s41_s13, %s41_s13 }
   0xb   :  { %p174_p3 = scmp.ne.s32.totalorder %s41_s13, %s173_s23  ;;  %p179_p5 = scmp.lt.s32.totalorder %s173_s23, %s173_s23 }
   0xd   :  { %p180_p6 = por %p179_p5, %p178_p4 }
   0xf   :  { %p181_p7 = pnand %p180_p6, %p174_p3 }
  0x11   :  { %184 = shalt.err (!%p181_p7)
}
  0x12   :  { %s259_s24 = smov 128   ;;  %s260_s25 = smov 8  }
  0x13   :  { %46 = dma.hbm_to_vmem [thread:$0]  %s352_s1, 256, %s41_s13, [#allocation6], %s259_s24, %s259_s24, %s260_s25  }
  0x14   :  { %s185_s30 = scalar_lea.hbm %s351_s0, 256 }
  0x15   :  { %p186_p8 = scmp.ne.s32.totalorder %s351_s0, %s185_s30  ;;  %p189_p9 = scmp.lt.u32.totalorder %s185_s30, %s351_s0 }
  0x17   :  { %p191_p10 = pnand %p189_p9, %p186_p8 }
  0x19   :  { %194 = shalt.err (!%p191_p10)
}
  0x1a   :  { %s195_s8 = scalar_lea.vmem %s284_s15, 256  ;;  %p200_p12 = scmp.lt.s32.totalorder %s284_s15, %s284_s15 }
  0x1b   :  { %p196_p11 = scmp.ne.s32.totalorder %s284_s15, %s195_s8  ;;  %p201_p13 = scmp.lt.s32.totalorder %s195_s8, %s195_s8 }
  0x1d   :  { %p202_p0 = por %p201_p13, %p200_p12 }
  0x1f   :  { %p203_p1 = pnand %p202_p0, %p196_p11 }
  0x21   :  { %206 = shalt.err (!%p203_p1)
}
  0x22   :  { %28 = dma.hbm_to_vmem [thread:$0]  %s351_s0, 256, %s284_s15, [#allocation3], %s259_s24, %s259_s24, %s260_s25  }
  0x23   :  { %s261_s10 = smov [#allocation7]   ;;  %s207_s14 = scalar_lea.hbm %s353_s2, 256 }
  0x24   :  { %s58_s11 = sshll.u32 %s261_s10, 4  ;;  %p208_p2 = scmp.ne.s32.totalorder %s353_s2, %s207_s14  ;;  %s59_s11 = int_to_ptr.vmem [resolvable:$true] %s58_s11 }
  0x25   :  { %p211_p3 = scmp.lt.u32.totalorder %s207_s14, %s353_s2 }
  0x27   :  { %p213_p4 = pnand %p211_p3, %p208_p2 }
  0x29   :  { %216 = shalt.err (!%p213_p4)
}
  0x2a   :  { %s217_s20 = scalar_lea.vmem %s59_s11, 256  ;;  %p222_p6 = scmp.lt.s32.totalorder %s59_s11, %s59_s11 }
  0x2b   :  { %p218_p5 = scmp.ne.s32.totalorder %s59_s11, %s217_s20  ;;  %p223_p7 = scmp.lt.s32.totalorder %s217_s20, %s217_s20 }
  0x2d   :  { %p224_p8 = por %p223_p7, %p222_p6 }
  0x2f   :  { %p225_p9 = pnand %p224_p8, %p218_p5 }
  0x31   :  { %228 = shalt.err (!%p225_p9)
}
  0x32   :  { %64 = dma.hbm_to_vmem [thread:$0]  %s353_s2, 256, %s59_s11, [#allocation6], %s259_s24, %s259_s24, %s260_s25  }
  0x33   :  { %251 = dma.done.wait [#allocation3], 256  }
  0x34   :  { %252 = vsyncadd [#allocation3], 4294967040 }
  0x35   :  { %253 = dma.done.wait [#allocation6], 512  }
  0x36   :  { %254 = vsyncadd [#allocation6], 4294966784  ;;  %v94_v0 = vld [vmem:[#allocation2] sm:$0xff]  ;;  %v95_v1 = vld [vmem:[#allocation2 + $0x8] sm:$0xff]  ;;  %v262_v9 = vmov 0.0   ;;  %s263_s2 = smov [#allocation8]  }
  0x37   :  { %v96_v2 = vld [vmem:[#allocation5] sm:$0xff]  ;;  %v97_v3 = vld [vmem:[#allocation5 + $0x8] sm:$0xff]  ;;  %v98_v4 = vld [vmem:[#allocation7] sm:$0xff]  ;;  %s137_s21 = sshll.u32 %s263_s2, 4  ;;  %s138_s21 = int_to_ptr.vmem [resolvable:$true] %s137_s21 }
  0x38   :  { %v99_v5 = vld [vmem:[#allocation7 + $0x8] sm:$0xff]  ;;  %v100_v6 = vsub.f32 %v94_v0, %v96_v2  ;;  %v101_v7 = vsub.f32 %v95_v1, %v97_v3  ;;  %vm104_vm0 = vcmp.eq.f32.partialorder %v98_v4, 1.0  ;;  %vm106_vm2 = vcmp.eq.f32.partialorder %v98_v4, 0.0  ;;  %s229_s22 = scalar_lea.vmem %s138_s21, 512  ;;  %p234_p11 = scmp.lt.s32.totalorder %s138_s21, %s138_s21 }
  0x39   :  { %vm105_vm1 = vcmp.eq.f32.partialorder %v99_v5, 1.0  ;;  %vm107_vm3 = vcmp.eq.f32.partialorder %v99_v5, 0.0  ;;  %v114_v10 = vsel %vm104_vm0, 1.0, %v262_v9  ;;  %v117_v14 = vsel %vm106_vm2, 1.0, %v262_v9  ;;  %p230_p10 = scmp.ne.s32.totalorder %s138_s21, %s229_s22  ;;  %p235_p12 = scmp.lt.s32.totalorder %s229_s22, %s229_s22 }
  0x3a   :  { %v102_v8 = vmul.f32 %v100_v6, %v100_v6  ;;  %v115_v11 = vsel %vm105_vm1, 1.0, %v262_v9  ;;  %v103_v12 = vmul.f32 %v101_v7, %v101_v7  ;;  %v118_v15 = vsel %vm107_vm3, 1.0, %v262_v9 }
  0x3b   :  { %v116_v13 = vadd.f32 %v115_v11, %v114_v10  ;;  %v119_v18 = vadd.f32 %v118_v15, %v117_v14  ;;  %p236_p13 = por %p235_p12, %p234_p11 }
  0x3c   :  { %v108_v16 = vsel %vm104_vm0, %v102_v8, 0.0  ;;  %v111_v17 = vsel %vm106_vm2, %v102_v8, 0.0  ;;  %v109_v19 = vsel %vm105_vm1, %v103_v12, 0.0  ;;  %v112_v20 = vsel %vm107_vm3, %v103_v12, 0.0 }
  0x3d   :  { %v110_v21 = vadd.f32 %v109_v19, %v108_v16  ;;  %v113_v22 = vadd.f32 %v112_v20, %v111_v17  ;;  %130 = vst [vmem:[#allocation8 + $0x10] sm:$0xff] %v116_v13  ;;  %131 = vst [vmem:[#allocation8 + $0x18] sm:$0xff] %v119_v18  ;;  %p237_p0 = pnand %p236_p13, %p230_p10 }
  0x3f   :  { %128 = vst [vmem:[#allocation8] sm:$0xff] %v110_v21  ;;  %129 = vst [vmem:[#allocation8 + $0x8] sm:$0xff] %v113_v22 }
  0x40   :  { %240 = shalt.err (!%p237_p0)
}
  0x41   :  { %s241_s27 = scalar_lea.hbm %s354_s3, 512 }
  0x42   :  { %p242_p1 = scmp.ne.s32.totalorder %s354_s3, %s241_s27  ;;  %p245_p2 = scmp.lt.u32.totalorder %s241_s27, %s354_s3 }
  0x44   :  { %p247_p3 = pnand %p245_p2, %p242_p1 }
  0x46   :  { %250 = shalt.err (!%p247_p3)
}
  0x47   :  { %143 = dma.vmem_to_hbm [thread:$0]  %s138_s21, 512, %s354_s3, [#allocation4], %s259_s24, %s259_s24, %s260_s25  }
  0x48   :  { %255 = dma.done.wait [#allocation4], 512  }
  0x49   :  { %256 = vsyncadd [#allocation4], 4294966784 }
  0x4a   :  { %147 = vsyncpa [#allocation3], 1 }
  0x4b   :  { %148 = vsyncpa [#allocation6], 1 }
  0x4c   :  { %149 = vsyncpa [#allocation4], 1 }

</bundles_post_ra>
